<compile_context>
chip_gen: v7x
topology: tpu7x:2x2x1
jax: 0.10.0
libtpu: 0.0.40
codegen_flags: <defaults>
</compile_context>

<pallas_src>
import jax
import jax.numpy as jnp
from jax.experimental import pallas as pl
from jax.experimental.pallas import tpu as pltpu


# --------------------------- fused GCN + TCN + ReLU kernel ---------------------------
def stgcn_fused_kernel(x_ref, a_ref, wg_ref, bg_ref, wt_ref, bt_ref, o_ref):
    """One packed batch tile (Bt batch elements) per grid step.

    x_ref : (Bt, N, T*C_in)          f32  node-major, frames stacked along lanes
    a_ref : (N, N)                   bf16 shared per-frame normalized adjacency
    wg_ref: (T*C_in, T*C_out)        bf16 block-diagonal GCN weight (one W_g per frame)
    bg_ref: (1, T*C_out)             f32  GCN bias tiled over frames
    wt_ref: (T*C_out, T_out*C_out)   bf16 banded temporal-conv weight (pad + stride baked in)
    bt_ref: (1, T_out*C_out)         f32  conv bias tiled over output frames
    o_ref : (Bt, N, T_out*C_out)     bf16 lane-dense output
    """
    Bt, N, f_in = x_ref.shape
    f_out = wt_ref.shape[1]

    # In-kernel f32 -> bf16 cast: a few VPU ops that hide under the matmuls.
    x = x_ref[...].astype(jnp.bfloat16)                                 # (Bt, N, T*C_in)

    # Reassociated GCN: (A_hat @ X) @ Wg.  A_hat acts on the node dim only, so one batched
    # (N,N)@(N, T*C_in) contraction covers all T frames at the narrow T*C_in width.
    a_b = jnp.broadcast_to(a_ref[...], (Bt, N, N))                      # tiny bf16 broadcast
    ax = jnp.einsum('bnm,bmf->bnf', a_b, x,
                    preferred_element_type=jnp.float32)                 # (Bt, N, T*C_in) f32

    # Collapse (Bt, N) -> Bt*N rows (free: N is a multiple of 8, lane dim unchanged).
    axr = ax.astype(jnp.bfloat16).reshape(Bt * N, f_in)                 # (128, T*C_in)

    # Block-diagonal GCN weight + bias: one wide 128-row matmul covers all frames.
    g = jnp.dot(axr, wg_ref[...], preferred_element_type=jnp.float32) + bg_ref[...]

    # Temporal conv over all K taps == one banded matmul with a lane-dense contraction.
    y = jnp.dot(g.astype(jnp.bfloat16), wt_ref[...],
                preferred_element_type=jnp.float32) + bt_ref[...]

    # Fused ReLU in f32, then cast to the bf16 output (256-wide unmasked stores).
    o_ref[...] = jnp.maximum(y, 0.0).reshape(Bt, N, f_out).astype(o_ref.dtype)


# ------------------------------ weight preprocessing ---------------------------------
def build_block_diag_wg(W_g, T):
    """(C_in, C_out) -> block-diagonal (T*C_in, T*C_out): same W_g applied to every frame."""
    C_in, C_out = W_g.shape
    eye = jnp.eye(T, dtype=W_g.dtype)
    big = jnp.einsum('st,cd->sctd', eye, W_g)                    # (T, C_in, T, C_out)
    return big.reshape(T * C_in, T * C_out)


def build_banded_wt(W_t, T, stride, pad):
    """(K, C_out, C_out) -> banded (T*C_out, T_out*C_out).

    Block (t_in, t_out) = W_t[t_in - t_out*stride + pad] when that tap index is in [0, K);
    out-of-range frames simply have no block, which realizes the zero temporal padding.
    """
    K, C, D = W_t.shape
    T_out = (T + 2 * pad - K) // stride + 1
    t_in = jnp.arange(T)[:, None, None]
    t_o = jnp.arange(T_out)[None, :, None]
    dt = jnp.arange(K)[None, None, :]
    sel = (t_in == t_o * stride + dt - pad).astype(W_t.dtype)    # (T, T_out, K)
    big = jnp.einsum('iok,kcd->icod', sel, W_t)                  # (T, C, T_out, D)
    return big.reshape(T * C, T_out * D)


def prepare_stgcn_params(a_hat_frame, W_g, b_g, W_t, b_t, T, kernel_size, stride=1):
    """One-time (per parameter set) preprocessing.  Cache the result and reuse it across
    forward calls — these O(T^2) einsums must NOT rerun on every step."""
    K = kernel_size
    pad = (K - 1) // 2
    T_out = (T + 2 * pad - K) // stride + 1
    C_in, C_out = W_g.shape
    return dict(
        a=a_hat_frame.astype(jnp.bfloat16),
        wg=build_block_diag_wg(W_g, T).astype(jnp.bfloat16),
        bg=jnp.tile(b_g.astype(jnp.float32), (1, T)),            # (1, T*C_out)
        wt=build_banded_wt(W_t, T, stride, pad).astype(jnp.bfloat16),
        bt=jnp.tile(b_t.astype(jnp.float32), (1, T_out)),        # (1, T_out*C_out)
        T=T, T_out=T_out, C_in=C_in, C_out=C_out, K=K, stride=stride,
    )


# --------------------------------- block forward --------------------------------------
def _pick_batch_tile(B, N, target_rows=128):
    """Largest Bt with Bt | B and Bt*N <= target_rows.  128 rows keep the (rows, 256) f32
    intermediates at 32 vregs each (no spill) and already fill the v5e 128-row MXU."""
    bt = max(1, min(B, target_rows // max(N, 1)))
    while B % bt:
        bt -= 1
    return bt


def stgcn_block_forward(x_bntc, params):
    B, N, T, C_in = x_bntc.shape
    assert T == params["T"] and C_in == params["C_in"]
    assert N % 8 == 0, "node dim must be a multiple of the 8-sublane tile"
    T_out, C_out = params["T_out"], params["C_out"]

    Bt = _pick_batch_tile(B, N)                                  # Bt*N ~ 128 MXU rows
    f_in, f_g, f_o = T * C_in, T * C_out, T_out * C_out

    # (B, N, T, C_in) -> (B, N, T*C_in) is a free row-major reshape; the bf16 cast happens
    # inside the kernel so x is read from HBM exactly once, in its original dtype.
    x_flat = x_bntc.reshape(B, N, f_in)

    y = pl.pallas_call(
        stgcn_fused_kernel,
        out_shape=jax.ShapeDtypeStruct((B, N, f_o), jnp.bfloat16),
        grid=(B // Bt,),
        in_specs=[
            pl.BlockSpec((Bt, N, f_in), lambda b: (b, 0, 0)),
            pl.BlockSpec((N, N), lambda b: (0, 0)),
            pl.BlockSpec((f_in, f_g), lambda b: (0, 0)),
            pl.BlockSpec((1, f_g), lambda b: (0, 0)),
            pl.BlockSpec((f_g, f_o), lambda b: (0, 0)),
            pl.BlockSpec((1, f_o), lambda b: (0, 0)),
        ],
        out_specs=pl.BlockSpec((Bt, N, f_o), lambda b: (b, 0, 0)),
        compiler_params=pltpu.CompilerParams(
            dimension_semantics=("parallel",)),  # grid length B//Bt kept >=2 and even -> both v7x TCs busy
    )(x_flat, params["a"], params["wg"], params["bg"], params["wt"], params["bt"])

    # Free reshape back to the PyTorch output layout (B, N, T_out, C_out).
    return y.reshape(B, N, T_out, C_out)


# ------------------------ deterministic graph + f32 reference --------------------------
def build_frame_a_hat(N):
    """Shared per-frame normalized adjacency: spatial chain + self loops, symmetric norm."""
    A = jnp.zeros((N, N), jnp.float32)
    idx = jnp.arange(N - 1)
    A = A.at[idx, idx + 1].set(1.0)
    A = A.at[idx + 1, idx].set(1.0)
    A = A + jnp.eye(N, dtype=jnp.float32)
    deg = A.sum(axis=1)
    d = 1.0 / jnp.sqrt(deg)
    return A * d[:, None] * d[None, :]


def expand_a_hat_flat(a_frame, B, N, T):
    """Dense (B*N*T, B*N*T) A_hat in PyTorch's x.view(-1, C) row order (b, n, t)."""
    full = jnp.einsum('bc,nm,ts->bntcms',
                      jnp.eye(B, dtype=jnp.float32), a_frame, jnp.eye(T, dtype=jnp.float32))
    return full.reshape(B * N * T, B * N * T)


def reference_forward(x_bntc, a_full, W_g, b_g, W_t, b_t, K, stride=1):
    """Straight f32 JAX translation of the PyTorch module (dense GCN over the flat graph)."""
    B, N, T, C_in = x_bntc.shape
    C_out = W_g.shape[1]
    g = a_full @ (x_bntc.reshape(-1, C_in) @ W_g) + b_g          # (B*N*T, C_out)
    g = g.reshape(B, N, T, C_out).transpose(0, 2, 1, 3)          # (B, T, N, C)
    pad = (K - 1) // 2
    gp = jnp.pad(g, ((0, 0), (pad, pad), (0, 0), (0, 0)))
    T_out = (T + 2 * pad - K) // stride + 1
    out = jnp.zeros((B, T_out, N, C_out), jnp.float32)
    for dt in range(K):
        out = out + jnp.einsum('btnc,cd->btnd',
                               gp[:, dt:dt + stride * T_out:stride], W_t[dt])
    out = jnp.maximum(out + b_t[0], 0.0)
    return out.transpose(0, 2, 1, 3)                             # (B, N, T_out, C_out)


if __name__ == "__main__":
    # B chosen so the packed grid is (B // Bt) = 2 — even and >= 2 (keeps both v7x TCs busy),
    # while each grid step feeds 128 (batch x node) rows to the MXU.
    B, N, T = 16, 16, 8
    C_in, C_out, K, stride = 4, 32, 3, 1

    key = jax.random.PRNGKey(0)
    k0, k1, k2, k3, k4 = jax.random.split(key, 5)

    x = jax.random.normal(k0, (B, N, T, C_in), dtype=jnp.float32)
    a_frame = build_frame_a_hat(N)                               # shared (N, N) normalized adjacency

    # GCNConv params: linear weight (C_in, C_out) + bias
    W_g = jax.random.normal(k1, (C_in, C_out), dtype=jnp.float32) * 0.2
    b_g = jax.random.normal(k2, (1, C_out), dtype=jnp.float32) * 0.05
    # Conv2d params: torch weight (C_out, C_out, K, 1) stored here as (K, C_in=C_out, C_out)
    W_t = jax.random.normal(k3, (K, C_out, C_out), dtype=jnp.float32) * 0.1
    b_t = jax.random.normal(k4, (1, C_out), dtype=jnp.float32) * 0.05

    # Preprocessing runs ONCE per parameter set (module state), not per forward call.
    params = prepare_stgcn_params(a_frame, W_g, b_g, W_t, b_t, T, K, stride)

    out = stgcn_block_forward(x, params)
    out = jax.block_until_ready(out)

    pad = (K - 1) // 2
    T_out = (T + 2 * pad - K) // stride + 1
    assert out.shape == (B, N, T_out, C_out), out.shape          # stride-aware shape check
    assert out.dtype == jnp.bfloat16

    # Validate against the dense flat-graph f32 reference (also checks the block-diagonal
    # A_hat factorization).  Tolerance documents the inference precision: bf16 MXU inputs
    # and bf16 output with f32 accumulation; bias-add / ReLU are kept in f32.
    out_f32 = out.astype(jnp.float32)
    assert bool(jnp.all(jnp.isfinite(out_f32)))
    a_full = expand_a_hat_flat(a_frame, B, N, T)
    ref = reference_forward(x, a_full, W_g, b_g, W_t, b_t, K, stride)
    assert bool(jnp.allclose(out_f32, ref, atol=6e-2, rtol=6e-2)), \
        float(jnp.max(jnp.abs(out_f32 - ref)))

    print("KERNEL_OK")
</pallas_src>

<mosaic_0001>
module attributes {stable_mosaic.version = 11 : i64} {
  func.func @stgcn_fused_kernel(%arg0: i32, %arg1: memref<8x16x32xf32, #tpu.memory_space<vmem>>, %arg2: memref<16x16xbf16, #tpu.memory_space<vmem>>, %arg3: memref<32x256xbf16, #tpu.memory_space<vmem>>, %arg4: memref<1x256xf32, #tpu.memory_space<vmem>>, %arg5: memref<256x256xbf16, #tpu.memory_space<vmem>>, %arg6: memref<1x256xf32, #tpu.memory_space<vmem>>, %arg7: memref<8x16x256xbf16, #tpu.memory_space<vmem>>) attributes {dimension_semantics = [#tpu.dimension_semantics<parallel>], iteration_bounds = array<i64: 2>, scalar_prefetch = 0 : i64, scratch_operands = 0 : i64, tpu.core_type = #tpu.core_type<tc>, window_params = [{transform_indices = @transform_0, window_bounds = array<i64: 8, 16, 32>}, {pipeline_mode = #tpu.pipeline_mode<synchronous>, transform_indices = @transform_1, window_bounds = array<i64: 16, 16>}, {pipeline_mode = #tpu.pipeline_mode<synchronous>, transform_indices = @transform_2, window_bounds = array<i64: 32, 256>}, {pipeline_mode = #tpu.pipeline_mode<synchronous>, transform_indices = @transform_3, window_bounds = array<i64: 1, 256>}, {pipeline_mode = #tpu.pipeline_mode<synchronous>, transform_indices = @transform_4, window_bounds = array<i64: 256, 256>}, {pipeline_mode = #tpu.pipeline_mode<synchronous>, transform_indices = @transform_5, window_bounds = array<i64: 1, 256>}, {transform_indices = @transform_6, window_bounds = array<i64: 8, 16, 256>}]} {
    %c0 = arith.constant 0 : index
    %c0_0 = arith.constant 0 : index
    %c0_1 = arith.constant 0 : index
    %0 = vector.load %arg1[%c0, %c0_0, %c0_1] : memref<8x16x32xf32, #tpu.memory_space<vmem>>, vector<8x16x32xf32>
    %1 = arith.truncf %0 : vector<8x16x32xf32> to vector<8x16x32xbf16>
    %c0_2 = arith.constant 0 : index
    %c0_3 = arith.constant 0 : index
    %2 = vector.load %arg2[%c0_2, %c0_3] : memref<16x16xbf16, #tpu.memory_space<vmem>>, vector<16x16xbf16>
    %3 = vector.shape_cast %2 : vector<16x16xbf16> to vector<1x16x16xbf16>
    %4 = vector.broadcast %3 : vector<1x16x16xbf16> to vector<8x16x16xbf16>
    "tpu.trace_start"() <{level = 10 : i32, message = "bnm,bmf->bnf"}> : () -> ()
    %cst = arith.constant dense<0.000000e+00> : vector<8x16x32xf32>
    %5 = tpu.matmul %4, %1, %cst {dimension_numbers = #tpu.dot_dimension_numbers<[2], [1], [1], [2], [0, 0, 0, 1, 1, 2], [0], [0]>} : vector<8x16x16xbf16>, vector<8x16x32xbf16>, vector<8x16x32xf32> -> vector<8x16x32xf32>
    "tpu.trace_stop"() : () -> ()
    %6 = arith.truncf %5 : vector<8x16x32xf32> to vector<8x16x32xbf16>
    %7 = vector.shape_cast %6 : vector<8x16x32xbf16> to vector<128x32xbf16>
    %c0_4 = arith.constant 0 : index
    %c0_5 = arith.constant 0 : index
    %8 = vector.load %arg3[%c0_4, %c0_5] : memref<32x256xbf16, #tpu.memory_space<vmem>>, vector<32x256xbf16>
    %cst_6 = arith.constant dense<0.000000e+00> : vector<128x256xf32>
    %9 = tpu.matmul %7, %8, %cst_6 {dimension_numbers = #tpu.dot_dimension_numbers<[1], [0], [0], [1], [0, 0, 1, 1], [], []>} : vector<128x32xbf16>, vector<32x256xbf16>, vector<128x256xf32> -> vector<128x256xf32>
    %c0_7 = arith.constant 0 : index
    %c0_8 = arith.constant 0 : index
    %10 = vector.load %arg4[%c0_7, %c0_8] : memref<1x256xf32, #tpu.memory_space<vmem>>, vector<1x256xf32>
    %11 = vector.broadcast %10 : vector<1x256xf32> to vector<128x256xf32>
    %12 = arith.addf %9, %11 : vector<128x256xf32>
    %13 = arith.truncf %12 : vector<128x256xf32> to vector<128x256xbf16>
    %c0_9 = arith.constant 0 : index
    %c0_10 = arith.constant 0 : index
    %14 = vector.load %arg5[%c0_9, %c0_10] : memref<256x256xbf16, #tpu.memory_space<vmem>>, vector<256x256xbf16>
    %cst_11 = arith.constant dense<0.000000e+00> : vector<128x256xf32>
    %15 = tpu.matmul %13, %14, %cst_11 {dimension_numbers = #tpu.dot_dimension_numbers<[1], [0], [0], [1], [0, 0, 1, 1], [], []>} : vector<128x256xbf16>, vector<256x256xbf16>, vector<128x256xf32> -> vector<128x256xf32>
    %c0_12 = arith.constant 0 : index
    %c0_13 = arith.constant 0 : index
    %16 = vector.load %arg6[%c0_12, %c0_13] : memref<1x256xf32, #tpu.memory_space<vmem>>, vector<1x256xf32>
    %17 = vector.broadcast %16 : vector<1x256xf32> to vector<128x256xf32>
    %18 = arith.addf %15, %17 : vector<128x256xf32>
    %cst_14 = arith.constant 0.000000e+00 : f32
    %19 = vector.broadcast %cst_14 : f32 to vector<128x256xf32>
    %20 = arith.maximumf %18, %19 : vector<128x256xf32>
    %21 = vector.shape_cast %20 : vector<128x256xf32> to vector<8x16x256xf32>
    %22 = arith.truncf %21 : vector<8x16x256xf32> to vector<8x16x256xbf16>
    %c0_15 = arith.constant 0 : index
    %c0_16 = arith.constant 0 : index
    %c0_17 = arith.constant 0 : index
    %23 = vector.load %arg7[%c0_15, %c0_16, %c0_17] : memref<8x16x256xbf16, #tpu.memory_space<vmem>>, vector<8x16x256xbf16>
    tpu.vector_store %arg7[%c0_15, %c0_16, %c0_17], %22 {strides = array<i32>} : memref<8x16x256xbf16, #tpu.memory_space<vmem>>, vector<8x16x256xbf16>,
    return
  }
  func.func @transform_0(%arg0: i32) -> (i32, i32, i32) {
    %c0_i32 = arith.constant 0 : i32
    %c0_i32_0 = arith.constant 0 : i32
    %c0_i32_1 = arith.constant 0 : i32
    return %arg0, %c0_i32, %c0_i32_0 : i32, i32, i32
  }
  func.func @transform_1(%arg0: i32) -> (i32, i32) {
    %c0_i32 = arith.constant 0 : i32
    %c0_i32_0 = arith.constant 0 : i32
    %c0_i32_1 = arith.constant 0 : i32
    return %c0_i32, %c0_i32_0 : i32, i32
  }
  func.func @transform_2(%arg0: i32) -> (i32, i32) {
    %c0_i32 = arith.constant 0 : i32
    %c0_i32_0 = arith.constant 0 : i32
    %c0_i32_1 = arith.constant 0 : i32
    return %c0_i32, %c0_i32_0 : i32, i32
  }
  func.func @transform_3(%arg0: i32) -> (i32, i32) {
    %c0_i32 = arith.constant 0 : i32
    %c0_i32_0 = arith.constant 0 : i32
    %c0_i32_1 = arith.constant 0 : i32
    return %c0_i32, %c0_i32_0 : i32, i32
  }
  func.func @transform_4(%arg0: i32) -> (i32, i32) {
    %c0_i32 = arith.constant 0 : i32
    %c0_i32_0 = arith.constant 0 : i32
    %c0_i32_1 = arith.constant 0 : i32
    return %c0_i32, %c0_i32_0 : i32, i32
  }
  func.func @transform_5(%arg0: i32) -> (i32, i32) {
    %c0_i32 = arith.constant 0 : i32
    %c0_i32_0 = arith.constant 0 : i32
    %c0_i32_1 = arith.constant 0 : i32
    return %c0_i32, %c0_i32_0 : i32, i32
  }
  func.func @transform_6(%arg0: i32) -> (i32, i32, i32) {
    %c0_i32 = arith.constant 0 : i32
    %c0_i32_0 = arith.constant 0 : i32
    %c0_i32_1 = arith.constant 0 : i32
    return %arg0, %c0_i32, %c0_i32_0 : i32, i32, i32
  }
}

</mosaic_0001>

<bundles_post_ra>
// kernel: tpu_custom_call.1
= control target key start
LH: loop header
LB: loop body
LE: loop exit
PB: predicated region body
PF: predicated region fallthrough
CT: control target
= control target key end

     0   :  { %s2580_s0 = inlined_call_operand.hbm [shape: f32[16,16,32], index: 0, kind: input, shape index: {}]   ;;  %s2581_s1 = inlined_call_operand.hbm [shape: bf16[16,16], index: 1, kind: input, shape index: {}]   ;;  %s2582_s2 = inlined_call_operand.hbm [shape: bf16[32,256], index: 2, kind: input, shape index: {}]   ;;  %s2583_s3 = inlined_call_operand.vmem [shape: f32[1,256], index: 3, kind: input, shape index: {}]   ;;  %s2584_s4 = inlined_call_operand.hbm [shape: bf16[256,256], index: 4, kind: input, shape index: {}]   ;;  %s2585_s5 = inlined_call_operand.vmem [shape: f32[1,256], index: 5, kind: input, shape index: {}]   ;;  %s2586_s6 = inlined_call_operand.hbm [shape: bf16[16,16,256], index: 6, kind: output, shape index: {}]  }
   0x1   :  { %2590 = sst [smem:[#allocation15_spill]] %s2581_s1 }
   0x2   :  { %11 = vsyncpa [#allocation3], 0 }
   0x3   :  { %13 = vsyncpa [#allocation3 + $0x1], 0 }
   0x4   :  { %14 = vsyncpa [#allocation6], 0 }
   0x5   :  { %15 = vsyncpa [#allocation9], 0 }
   0x6   :  { %16 = vsyncpa [#allocation4], 0 }
   0x7   :  { %18 = vsyncpa [#allocation4 + $0x1], 0  ;;  %s2044_s21 = smov 0   ;;  %s2046_s22 = smov 0  }
   0x8   :  { %s2048_s23 = smov 0   ;;  %s2050_s24 = smov 0  }
   0x9 LB: > { %s2065_s25 = sadd.s32 4294967295, %s1993_s24   ;;  %s1457_s26 = sadd.s32 4294967294, %s1993_s24   ;;  %s1993_s24 = sphi %s2050_s24, %s2611_s24   ;;  %s1989_s23 = sphi %s2048_s23, %s2610_s23   ;;  %s1985_s22 = sphi %s2046_s22, %s2609_s22   ;;  %s1981_s21 = sphi %s2044_s21, %s2608_s21  }
   0xa   : > { %p44_p0 = scmp.ne.s32.totalorder %s1985_s22, %s1981_s21  ;;  %p2587_p1 = scmp.eq.s32.totalorder %s2065_s25, 0 }
   0xb   : > { %p179_p3 = scmp.eq.s32.totalorder %s1457_s26, 1  ;;  %p1458_p5 = scmp.ge.s32.totalorder %s1993_s24, 1 }
   0xc   : > { %p2074_p4 = por %p2587_p1, %p44_p0  ;;  %p186_p7 = scmp.lt.s32.totalorder %s1993_s24, 3 }
   0xd   : > { %p2079_p6 = por %p179_p3, %p44_p0  ;;  %s1995_s30 = smov [#allocation5]  }
   0xe   : > { %s2591_s27 = scalar_select %p2074_p4, 1, 0 }
   0xf   : > { %s2592_s28 = scalar_select %p2079_p6, 1, 0 }
  0x10   : > { %p2084_p8 = pnand %p1458_p5, %p186_p7  ;;  %s198_s7 = sshll.u32 %s1995_s30, 4  ;;  %s2088_s7 = int_to_ptr.vmem [resolvable:$true] %s198_s7 }
  0x11   : > { %s1996_s9 = smov [#allocation7]   ;;  %s2595_s1 = sld [smem:[#allocation15_spill]] }
  0x12   : > { %s2593_s29 = scalar_select %p2084_p8, 1, 0 }
  0x13   : > { %p1680_p9 = pneg %p2084_p8  ;;  %s211_s10 = sshll.u32 %s1996_s9, 4  ;;  %s2099_s10 = int_to_ptr.vmem [resolvable:$true] %s211_s10 }
  0x15   : > { %p2095_p11 = pnand %p1680_p9, %p2587_p1 }
  0x17   : > { %s1805_s13 = scalar_lea.hbm %s2595_s1, 128  ;;  %p2109_p13 = pneg %p2095_p11 }
  0x18   : > { %p1806_p12 = scmp.ne.s32.totalorder %s2595_s1, %s1805_s13  ;;  %p1812_p5 = scmp.lt.u32.totalorder %s1805_s13, %s2595_s1 }
  0x1a   : > { %p1808_p0 = pnand %p2109_p13, %p1806_p12 }
  0x1c   : > { %p1809_p3 = pneg %p1808_p0 }
  0x1e   : > { %p1814_p7 = pnand %p1812_p5, %p1809_p3 }
  0x20   : > { %1817 = shalt.err (!%p1814_p7)
}
  0x21   : > { %s1818_s19 = scalar_lea.vmem %s2088_s7, 128  ;;  %p1826_p2 = scmp.lt.s32.totalorder %s2088_s7, %s2088_s7 }
  0x22   : > { %p1819_p9 = scmp.ne.s32.totalorder %s2088_s7, %s1818_s19  ;;  %p1827_p6 = scmp.lt.s32.totalorder %s1818_s19, %s1818_s19 }
  0x24   : > { %p1821_p10 = pnand %p1819_p9, %p2109_p13  ;;  %p1828_p12 = por %p1827_p6, %p1826_p2 }
  0x26   : > { %p1822_p1 = pneg %p1821_p10 }
  0x28   : > { %p1829_p0 = pnand %p1828_p12, %p1822_p1 }
  0x2a   : > { %1832 = shalt.err (!%p1829_p0)
}
  0x2b   : > { %s1997_s20 = smov 64   ;;  %s1998_s26 = smov 4  }
  0x2c   : > { %1683 = dma.hbm_to_vmem [thread:$0]  (!%p2095_p11), %s2595_s1, 128, %s2088_s7, [#allocation6], %s1997_s20, %s1997_s20, %s1998_s26  }
  0x2d   : > { %s1833_s13 = scalar_lea.hbm %s2582_s2, 512 }
  0x2e   : > { %p1834_p2 = scmp.ne.s32.totalorder %s2582_s2, %s1833_s13  ;;  %p1840_p10 = scmp.lt.u32.totalorder %s1833_s13, %s2582_s2 }
  0x30   : > { %p1836_p1 = pnand %p1834_p2, %p2109_p13 }
  0x32   : > { %p1837_p6 = pneg %p1836_p1 }
  0x34   : > { %p1842_p3 = pnand %p1840_p10, %p1837_p6 }
  0x36   : > { %1845 = shalt.err (!%p1842_p3)
}
  0x37   : > { %s1846_s7 = scalar_lea.vmem %s2099_s10, 512  ;;  %p1854_p12 = scmp.lt.s32.totalorder %s2099_s10, %s2099_s10 }
  0x38   : > { %p1847_p5 = scmp.ne.s32.totalorder %s2099_s10, %s1846_s7  ;;  %p1855_p0 = scmp.lt.s32.totalorder %s1846_s7, %s1846_s7 }
  0x3a   : > { %p1849_p7 = pnand %p1847_p5, %p2109_p13  ;;  %p1856_p2 = por %p1855_p0, %p1854_p12 }
  0x3c   : > { %p1850_p9 = pneg %p1849_p7 }
  0x3e   : > { %p1857_p1 = pnand %p1856_p2, %p1850_p9 }
  0x40   : > { %1860 = shalt.err (!%p1857_p1)
}
  0x41   : > { %s1999_s19 = smov 128   ;;  %s2000_s20 = smov 8  }
  0x42   : > { %1686 = dma.hbm_to_vmem [thread:$0]  (!%p2095_p11), %s2582_s2, 512, %s2099_s10, [#allocation6], %s1999_s19, %s1999_s19, %s2000_s20  }
  0x43   : > { %s2001_s9 = smov [#allocation8]   ;;  %s2157_s12 = sadd.s32 1, %s1993_s24  }
  0x44   : > { %s227_s11 = sshll.u32 %s2001_s9, 4  ;;  %s1861_s15 = scalar_lea.hbm %s2584_s4, 4096  ;;  %s228_s11 = int_to_ptr.vmem [resolvable:$true] %s227_s11 }
  0x45   : > { %p1862_p6 = scmp.ne.s32.totalorder %s2584_s4, %s1861_s15  ;;  %p1868_p5 = scmp.lt.u32.totalorder %s1861_s15, %s2584_s4 }
  0x47   : > { %p1864_p10 = pnand %p1862_p6, %p2109_p13 }
  0x49   : > { %p1865_p3 = pneg %p1864_p10 }
  0x4b   : > { %p1870_p7 = pnand %p1868_p5, %p1865_p3 }
  0x4d   : > { %1873 = shalt.err (!%p1870_p7)
}
  0x4e   : > { %s1874_s10 = scalar_lea.vmem %s228_s11, 4096  ;;  %p1882_p2 = scmp.lt.s32.totalorder %s228_s11, %s228_s11 }
  0x4f   : > { %p1875_p9 = scmp.ne.s32.totalorder %s228_s11, %s1874_s10  ;;  %p1883_p1 = scmp.lt.s32.totalorder %s1874_s10, %s1874_s10 }
  0x51   : > { %p1877_p12 = pnand %p1875_p9, %p2109_p13  ;;  %p1884_p4 = por %p1883_p1, %p1882_p2 }
  0x53   : > { %p1878_p0 = pneg %p1877_p12 }
  0x55   : > { %p1885_p8 = pnand %p1884_p4, %p1878_p0 }
  0x57   : > { %1888 = shalt.err (!%p1885_p8)
}
  0x58   : > { %1689 = dma.hbm_to_vmem [thread:$0]  (!%p2095_p11), %s2584_s4, 4096, %s228_s11, [#allocation9], %s1999_s19, %s1999_s19, %s2000_s20  }
  0x59   : > { %s28_s16 = ssub.s32 %s1993_s24, %s2157_s12  ;;  %s31_s8 = sadd.s32 1, %s1989_s23 }
  0x5a   : > { %p29_p4 = scmp.eq.s32.totalorder %s28_s16, 0  ;;  %p38_p8 = scmp.ne.s32.totalorder %s1989_s23, %s1985_s22 }
  0x5b   : > { %p39_p13 = scmp.eq.s32.totalorder %s1993_s24, 0  ;;  %p1701_p6 = scmp.lt.s32.totalorder %s1993_s24, 2 }
  0x5c   : > { %s2188_s30 = scalar_select %p29_p4, %s1989_s23, %s31_s8  }
  0x5d   : > { %p40_p10 = por %p39_p13, %p38_p8  ;;  %p2597_p3 = scmp.eq.s32.totalorder %s2065_s25, 1 }
  0x5e   : > { %s244_s13 = sand.u32 1, %s1989_s23   ;;  %s1549_s14 = sshll.u32 %s1993_s24, 11 }
  0x5f   : > { %p2192_p5 = por %p2597_p3, %p38_p8  ;;  %s1463_s15 = sshll.u32 %s244_s13, 7 }
  0x60   : > { %s2201_s11 = scalar_lea.hbm %s2580_s0, %s1549_s14  ;;  %s248_s7 = scalar_lea.vmem [#allocation2], %s1463_s15 }
  0x61   : > { %s256_s10 = sshll.u32 %s248_s7, 4  ;;  %p2203_p11 = pnand %p1701_p6, %p40_p10  ;;  %s2207_s10 = int_to_ptr.vmem [resolvable:$true] %s256_s10 }
  0x62   : > { %s2209_s26 = scalar_lea.sflag [#allocation3], %s244_s13  ;;  %s1889_s16 = scalar_lea.hbm %s2201_s11, 2048 }
  0x63   : > { %p1890_p7 = scmp.ne.s32.totalorder %s2201_s11, %s1889_s16  ;;  %p1891_p9 = pneg %p2203_p11 }
  0x64   : > { %s1894_s15 = scalar_lea.hbm %s2580_s0, 4096  ;;  %p1895_p2 = scmp.lt.u32.totalorder %s2201_s11, %s2580_s0 }
  0x65   : > { %p1892_p12 = pnand %p1891_p9, %p1890_p7  ;;  %p1896_p1 = scmp.lt.u32.totalorder %s1894_s15, %s1889_s16 }
  0x66   : > { %p1898_p8 = scmp.lt.u32.totalorder %s1889_s16, %s2201_s11 }
  0x67   : > { %p1893_p0 = pneg %p1892_p12  ;;  %p1897_p4 = por %p1896_p1, %p1895_p2 }
  0x69   : > { %p1899_p13 = por %p1898_p8, %p1897_p4 }
  0x6b   : > { %p1900_p6 = pnand %p1899_p13, %p1893_p0 }
  0x6d   : > { %1903 = shalt.err (!%p1900_p6)
}
  0x6e   : > { %s1904_s13 = scalar_lea.vmem %s2207_s10, 2048  ;;  %s2002_s7 = smov [#allocation2]  }
  0x6f   : > { %p1905_p10 = scmp.ne.s32.totalorder %s2207_s10, %s1904_s13  ;;  %s1909_s8 = sshll.u32 %s2002_s7, 4  ;;  %s1910_s8 = int_to_ptr.vmem [resolvable:$false] %s1909_s8 }
  0x70   : > { %s1911_s14 = scalar_lea.vmem %s1910_s8, 4096  ;;  %p1912_p12 = scmp.lt.s32.totalorder %s2207_s10, %s1910_s8 }
  0x71   : > { %p1907_p3 = pnand %p1905_p10, %p1891_p9  ;;  %p1913_p2 = scmp.lt.s32.totalorder %s1911_s14, %s1904_s13 }
  0x73   : > { %p1908_p7 = pneg %p1907_p3  ;;  %p1914_p1 = por %p1913_p2, %p1912_p12 }
  0x75   : > { %p1915_p4 = pnand %p1914_p1, %p1908_p7 }
  0x77   : > { %1918 = shalt.err (!%p1915_p4)
}
  0x78   : > { %1693 = dma.hbm_to_vmem [thread:$0]  (!%p2203_p11), %s2201_s11, 2048, %s2207_s10, %s2209_s26, %s1999_s19, %s1999_s19, %s2000_s20  }
  0x79   : > { %p2600_p9 = scmp.ne.s32.totalorder %s2593_s29, 0 }
  0x7a   : > { %s2243_s16 = sand.u32 (!%p2600_p9), 1, %s1985_s22   ;;  %p2601_p0 = scmp.ne.s32.totalorder (!%p2600_p9), %s2591_s27, 0 }
  0x7b   : > { %268 = sbr.rel (%p2600_p9) target bundleno = 872 (0x368), region = 44  ;;  %s1468_s15 = sshll.u32 (!%p2600_p9), %s2243_s16, 7 }
  0x7c   : > { %s271_s17 = scalar_lea.sflag (!%p2600_p9), [#allocation3], %s2243_s16  ;;  %s2249_s1 = scalar_lea.vmem (!%p2600_p9), [#allocation2], %s1468_s15 }
  0x82   : > { %1964 = dma.done.wait (%p2601_p0), %s271_s17, 2048  }
  0x83   : > { %1966 = vsyncadd (%p2601_p0), %s271_s17, 4294965248  ;;  %p2602_p11 = scmp.eq.s32.totalorder %s2065_s25, 0 }
  0x85   : > { %1968 = dma.done.wait (%p2602_p11), [#allocation6], 640   ;;  %p2603_p8 = pmov %p2602_p11 }
  0x87   : > { %1970 = vsyncadd (%p2603_p8), [#allocation6], 4294966656  ;;  %p2604_p13 = pmov %p2603_p8 }
  0x88   : > { %p2605_p6 = pmov %p2603_p8 }
  0x89   : > { %1972 = dma.done.wait (%p2604_p13), [#allocation9], 4096  }
  0x8a   : > { %1974 = vsyncadd (%p2605_p6), [#allocation9], 4294963200  ;;  %v2003_v0 = vmov 0.0   ;;  %vm2004_vm0 = vmmov 0   ;;  %v318_v1 = vld [vmem:[%s2249_s1] sm:$0xff]  ;;  %v319_v2 = vld [vmem:[%s2249_s1 + $0x8] sm:$0xff] }
  0x8b   : > { %1584 = vmatprep.subr.bf16.mxu0 %v2003_v0  ;;  %1586 = vmatprep.mubr.msk.bf16.mxu0 %vm2004_vm0, %v2003_v0  ;;  %v334_v3 = vpack.c.bf16 %v319_v2, %v318_v1  ;;  %v1750_v4 = vld [vmem:[#allocation5] sm:$0xff]   ;;  %v320_v5 = vld [vmem:[%s2249_s1 + $0x10] sm:$0xff]  ;;  %v321_v6 = vld [vmem:[%s2249_s1 + $0x18] sm:$0xff]  ;;  %vm349_vm1 = vcmask 130048   ;;  %v2005_v30 = vmov 0   ;;  %vm725_vm2 = vcmask 261120  }
  0x8c   : > { %1590 = vmatprep.subr.bf16.mxu1 %v2003_v0  ;;  %1592 = vmatprep.mubr.msk.bf16.mxu1 %vm2004_vm0, %v2003_v0  ;;  %v322_v7 = vld [vmem:[%s2249_s1 + $0x20] sm:$0xff]  ;;  %v323_v8 = vld [vmem:[%s2249_s1 + $0x28] sm:$0xff]  ;;  %v335_v9 = vpack.c.bf16 %v321_v6, %v320_v5  ;;  %v324_v11 = vld [vmem:[%s2249_s1 + $0x30] sm:$0xff]  ;;  %s2483_s11 = scalar_lea.vmem [#allocation10], %s1468_s15  ;;  %s1567_s10 = sshll.u32 %s2065_s25, 11 }
  0x8d   : > { %1585 = vmatpush3.bf16.msra.mxu0 %v334_v3  ;;  %v336_v10 = vpack.c.bf16 %v323_v8, %v322_v7  ;;  %v325_v12 = vld [vmem:[%s2249_s1 + $0x38] sm:$0xff]  ;;  %v326_v14 = vld [vmem:[%s2249_s1 + $0x40] sm:$0xff]  ;;  %v327_v15 = vld [vmem:[%s2249_s1 + $0x48] sm:$0xff]  ;;  %s1355_s26 = sshll.u32 %s2483_s11, 4  ;;  %s2532_s7 = scalar_lea.hbm %s2586_s6, %s1567_s10  ;;  %s2534_s26 = int_to_ptr.vmem [resolvable:$true] %s1355_s26 }
  0x8e   : > { %1596 = vmatprep.subr.bf16.mxu0 %v2003_v0  ;;  %1591 = vmatpush3.bf16.msra.mxu1 %v335_v9  ;;  %v337_v13 = vpack.c.bf16 %v325_v12, %v324_v11  ;;  %v328_v16 = vld [vmem:[%s2249_s1 + $0x50] sm:$0xff]  ;;  %v329_v17 = vld [vmem:[%s2249_s1 + $0x58] sm:$0xff]  ;;  %v338_v18 = vpack.c.bf16 %v327_v15, %v326_v14  ;;  %v330_v20 = vld [vmem:[%s2249_s1 + $0x60] sm:$0xff]  ;;  %s1341_s8 = scalar_lea.sflag [#allocation4], %s2243_s16  ;;  %s1919_s14 = scalar_lea.vmem %s2534_s26, 2048 }
  0x8f   : > { %1602 = vmatprep.subr.bf16.mxu1 %v2003_v0  ;;  %v339_v19 = vpack.c.bf16 %v329_v17, %v328_v16  ;;  %v331_v21 = vld [vmem:[%s2249_s1 + $0x68] sm:$0xff]  ;;  %v332_v22 = vld [vmem:[%s2249_s1 + $0x70] sm:$0xff]  ;;  %v333_v23 = vld [vmem:[%s2249_s1 + $0x78] sm:$0xff]  ;;  %p1920_p10 = scmp.ne.s32.totalorder %s2534_s26, %s1919_s14  ;;  %s2006_s25 = smov [#allocation10]  }
  0x90   : > { %1587 = vmatmul.mubr.msk.bf16.vlgmr.msra.gmra.mrb[0].mxu0 %vm349_vm1, %v1750_v4  ;;  %v340_v24 = vpack.c.bf16 %v331_v21, %v330_v20  ;;  %v1753_v25 = vld [vmem:[#allocation7 + $0x4] ss:$8 sps:$4 sm:$0xff]   ;;  %v341_v26 = vpack.c.bf16 %v333_v23, %v332_v22  ;;  %v1751_v27 = vld [vmem:[#allocation7] ss:$8 sps:$4 sm:$0xff]   ;;  %v1756_v28 = vld [vmem:[#allocation7 + $0x14] ss:$8 sps:$4 sm:$0xff]  }
  0x91   : > { %1597 = vmatpush3.bf16.msra.mxu0 %v336_v10  ;;  %1598 = vmatprep.mubr.msk.bf16.mxu0 %vm2004_vm0, %v2003_v0  ;;  %v1754_v29 = vld [vmem:[#allocation7 + $0x10] ss:$8 sps:$4 sm:$0xff]   ;;  %v1759_v31 = vld [vmem:[#allocation8 + $0x4] ss:$8 sps:$4 sm:$0xff]   ;;  %v2296_v32 = vld [vmem:[#allocation8] ss:$8 sps:$4 sm:$0xff]   ;;  %p1921_p3 = pnand %p1920_p10, %p2192_p5 }
  0x92   : > { %1593 = vmatmul.mubr.msk.bf16.vlgmr.msra.gmra.mrb[0].mxu1 %vm349_vm1, %v1750_v4  ;;  %1608 = vmatprep.subr.bf16.mxu0 %v2003_v0  ;;  %v2298_v33 = vld [vmem:[#allocation8 + $0x14] ss:$8 sps:$4 sm:$0xff]   ;;  %v2302_v34 = vld [vmem:[#allocation8 + $0x10] ss:$8 sps:$4 sm:$0xff]   ;;  %v2304_v35 = vld [vmem:[#allocation8 + $0x24] ss:$8 sps:$4 sm:$0xff]  }
  0x93   : > { %1603 = vmatpush3.bf16.msra.mxu1 %v337_v13  ;;  %1604 = vmatprep.mubr.msk.bf16.mxu1 %vm2004_vm0, %v2003_v0  ;;  %v2308_v36 = vld [vmem:[#allocation8 + $0x20] ss:$8 sps:$4 sm:$0xff]   ;;  %v2310_v37 = vld [vmem:[#allocation8 + $0x34] ss:$8 sps:$4 sm:$0xff]   ;;  %v2314_v38 = vld [vmem:[#allocation8 + $0x30] ss:$8 sps:$4 sm:$0xff]   ;;  %p1922_p7 = pneg %p1921_p3 }
  0x94   : > { %1614 = vmatprep.subr.bf16.mxu1 %v2003_v0  ;;  %v2316_v39 = vld [vmem:[#allocation8 + $0x44] ss:$8 sps:$4 sm:$0xff]   ;;  %v2320_v40 = vld [vmem:[#allocation8 + $0x40] ss:$8 sps:$4 sm:$0xff]   ;;  %v2322_v41 = vld [vmem:[#allocation8 + $0x54] ss:$8 sps:$4 sm:$0xff]  }
  0x95   : > { %v2326_v42 = vld [vmem:[#allocation8 + $0x50] ss:$8 sps:$4 sm:$0xff]   ;;  %v2328_v43 = vld [vmem:[#allocation8 + $0x64] ss:$8 sps:$4 sm:$0xff]   ;;  %v2332_v44 = vld [vmem:[#allocation8 + $0x60] ss:$8 sps:$4 sm:$0xff]  }
  0x96   : > { %v2334_v45 = vld [vmem:[#allocation8 + $0x74] ss:$8 sps:$4 sm:$0xff]   ;;  %v2338_v46 = vld [vmem:[#allocation8 + $0x70] ss:$8 sps:$4 sm:$0xff]   ;;  %v2340_v47 = vld [vmem:[#allocation8 + $0x84] ss:$8 sps:$4 sm:$0xff]  }
  0x97   : > { %v2344_v48 = vld [vmem:[#allocation8 + $0x80] ss:$8 sps:$4 sm:$0xff]   ;;  %v2346_v49 = vld [vmem:[#allocation8 + $0x94] ss:$8 sps:$4 sm:$0xff]   ;;  %v2350_v50 = vld [vmem:[#allocation8 + $0x90] ss:$8 sps:$4 sm:$0xff]  }
  0x98   : > { %1599 = vmatmul.mubr.msk.bf16.vlgmr.msra.gmra.mrb[4].mxu0 %vm349_vm1, %v1750_v4  ;;  %v2352_v51 = vld [vmem:[#allocation8 + $0xa4] ss:$8 sps:$4 sm:$0xff]   ;;  %v2356_v52 = vld [vmem:[#allocation8 + $0xa0] ss:$8 sps:$4 sm:$0xff]   ;;  %v2358_v53 = vld [vmem:[#allocation8 + $0xb4] ss:$8 sps:$4 sm:$0xff]  }
  0x99   : > { %1609 = vmatpush3.bf16.msra.mxu0 %v338_v18  ;;  %1610 = vmatprep.mubr.msk.bf16.mxu0 %vm2004_vm0, %v2003_v0  ;;  %v2362_v54 = vld [vmem:[#allocation8 + $0xb0] ss:$8 sps:$4 sm:$0xff]   ;;  %v2364_v55 = vld [vmem:[#allocation8 + $0xc4] ss:$8 sps:$4 sm:$0xff]   ;;  %v2368_v56 = vld [vmem:[#allocation8 + $0xc0] ss:$8 sps:$4 sm:$0xff]  }
  0x9a   : > { %1605 = vmatmul.mubr.msk.bf16.vlgmr.msra.gmra.mrb[4].mxu1 %vm349_vm1, %v1750_v4  ;;  %1620 = vmatprep.subr.bf16.mxu0 %v2003_v0  ;;  %v2370_v57 = vld [vmem:[#allocation8 + $0xd4] ss:$8 sps:$4 sm:$0xff]   ;;  %v2374_v58 = vld [vmem:[#allocation8 + $0xd0] ss:$8 sps:$4 sm:$0xff]   ;;  %s1923_s15 = sshll.u32 %s2006_s25, 4  ;;  %s1924_s15 = int_to_ptr.vmem [resolvable:$false] %s1923_s15 }
  0x9b   : > { %1615 = vmatpush3.bf16.msra.mxu1 %v339_v19  ;;  %1616 = vmatprep.mubr.msk.bf16.mxu1 %vm2004_vm0, %v2003_v0  ;;  %s1925_s17 = scalar_lea.vmem %s1924_s15, 4096  ;;  %p1926_p12 = scmp.lt.s32.totalorder %s2534_s26, %s1924_s15 }
  0x9c   : > { %1626 = vmatprep.subr.bf16.mxu1 %v2003_v0  ;;  %p1927_p2 = scmp.lt.s32.totalorder %s1925_s17, %s1919_s14 }
  0x9e   : > { %p1928_p1 = por %p1927_p2, %p1926_p12 }
  0xa0   : > { %1611 = vmatmul.mubr.msk.bf16.vlgmr.msra.gmra.mrb[8].mxu0 %vm349_vm1, %v1750_v4  ;;  %p1929_p4 = pnand %p1928_p1, %p1922_p7 }
  0xa1   : > { %1621 = vmatpush3.bf16.msra.mxu0 %v340_v24  ;;  %1622 = vmatprep.mubr.msk.bf16.mxu0 %vm2004_vm0, %v2003_v0 }
  0xa2   : > { %1617 = vmatmul.mubr.msk.bf16.vlgmr.msra.gmra.mrb[8].mxu1 %vm349_vm1, %v1750_v4  ;;  %750 = vmatprep.subr.bf16.mxu0 %v1753_v25 }
  0xa3   : > { %1627 = vmatpush3.bf16.msra.mxu1 %v341_v26  ;;  %1628 = vmatprep.mubr.msk.bf16.mxu1 %vm2004_vm0, %v2003_v0 }
  0xa4   : > { %1632 = vmatprep.subr.bf16.mxu1 %v1759_v31 }
  0xa8   : > { %1623 = vmatmul.mubr.msk.bf16.vlgmr.msra.gmra.mrb[12].mxu0 %vm349_vm1, %v1750_v4 }
  0xa9   : > { %751 = vmatpush1.bf16.msra.mxu0 %v1751_v27  ;;  %782 = vmatprep.mubr.bf16.mxu0 %v2005_v30 }
  0xaa   : > { %1629 = vmatmul.mubr.msk.bf16.vlgmr.msra.gmra.mrb[12].mxu1 %vm349_vm1, %v1750_v4  ;;  %752 = vmatprep.subr.bf16.mxu0 %v1756_v28 }
  0xab   : > { %1648 = vmatpush1.bf16.msra.mxu1 %v2296_v32 }
  0xac   : > { %1633 = vmatprep.subr.bf16.mxu1 %v2298_v33 }
  0xad   : > { %753 = vmatpush1.bf16.msra.mxu0 %v1754_v29 }
  0xae   : > { %1083 = vmatprep.subr.bf16.mxu0 %v1759_v31 }
  0xaf   : > { %1649 = vmatpush1.bf16.msra.mxu1 %v2302_v34 }
  0xb0   : > { %1634 = vmatprep.subr.bf16.mxu1 %v2304_v35 }
  0xb3   : > { %1650 = vmatpush1.bf16.msra.mxu1 %v2308_v36 }
  0xb4   : > { %1635 = vmatprep.subr.bf16.mxu1 %v2310_v37 }
  0xb7   : > { %1651 = vmatpush1.bf16.msra.mxu1 %v2314_v38 }
  0xb8   : > { %1636 = vmatprep.subr.bf16.mxu1 %v2316_v39 }
  0xbb   : > { %1652 = vmatpush1.bf16.msra.mxu1 %v2320_v40 }
  0xbc   : > { %1637 = vmatprep.subr.bf16.mxu1 %v2322_v41 }
  0xbf   : > { %1653 = vmatpush1.bf16.msra.mxu1 %v2326_v42 }
  0xc0   : > { %1638 = vmatprep.subr.bf16.mxu1 %v2328_v43 }
  0xc3   : > { %1654 = vmatpush1.bf16.msra.mxu1 %v2332_v44 }
  0xc4   : > { %1639 = vmatprep.subr.bf16.mxu1 %v2334_v45 }
  0xc7   : > { %1655 = vmatpush1.bf16.msra.mxu1 %v2338_v46 }
  0xc8   : > { %1640 = vmatprep.subr.bf16.mxu1 %v2340_v47 }
  0xcb   : > { %1656 = vmatpush1.bf16.msra.mxu1 %v2344_v48 }
  0xcc   : > { %1641 = vmatprep.subr.bf16.mxu1 %v2346_v49 }
  0xcf   : > { %1657 = vmatpush1.bf16.msra.mxu1 %v2350_v50 }
  0xd0   : > { %1642 = vmatprep.subr.bf16.mxu1 %v2352_v51 }
  0xd3   : > { %1658 = vmatpush1.bf16.msra.mxu1 %v2356_v52 }
  0xd4   : > { %1643 = vmatprep.subr.bf16.mxu1 %v2358_v53 }
  0xd7   : > { %1659 = vmatpush1.bf16.msra.mxu1 %v2362_v54 }
  0xd8   : > { %1644 = vmatprep.subr.bf16.mxu1 %v2364_v55 }
  0xdb   : > { %1660 = vmatpush1.bf16.msra.mxu1 %v2368_v56 }
  0xdc   : > { %1645 = vmatprep.subr.bf16.mxu1 %v2370_v57 }
  0xdf   : > { %1661 = vmatpush1.bf16.msra.mxu1 %v2374_v58 }
 0x163   : > { %v387_v59 = vpop.f32.mrb[0].mxu0 }
 0x164   : > { %v1588_v60 = vpop.f32.mrb[1].mxu0 }
 0x165   : > { %v390_v61 = vpop.f32.mrb[2].mxu0  ;;  %v428_v62 = vpop.f32.mrb[0].mxu1 }
 0x166   : > { %v681_v63 = vpack.c.bf16 %v390_v61, %v387_v59  ;;  %v1589_v0 = vpop.f32.mrb[3].mxu0  ;;  %v1594_v1 = vpop.f32.mrb[1].mxu1 }
 0x167   : > { %v431_v2 = vpop.f32.mrb[2].mxu1 }
 0x168   : > { %1486 = vmatmul.mubr.msk.bf16.vlgmr.msra.gmra.mrb[16].mxu0 %vm725_vm2, %v681_v63  ;;  %v682_v3 = vpack.c.bf16 %v431_v2, %v428_v62  ;;  %v1595_v4 = vpop.f32.mrb[3].mxu1 }
 0x169   : > { %792 = vmatprep.mubr.bf16.mxu0 %v2005_v30  ;;  %1084 = vmatpush1.bf16.msra.mxu0 %v2296_v32 }
 0x16a   : > { %1085 = vmatprep.subr.bf16.mxu0 %v2298_v33 }
 0x16b   : > { %v469_v5 = vpop.f32.mrb[4].mxu0 }
 0x16c   : > { %v1600_v6 = vpop.f32.mrb[5].mxu0 }
 0x16d   : > { %v472_v7 = vpop.f32.mrb[6].mxu0  ;;  %v510_v8 = vpop.f32.mrb[4].mxu1  ;;  %1086 = vmatpush1.bf16.msra.mxu0 %v2302_v34 }
 0x16e   : > { %v683_v9 = vpack.c.bf16 %v472_v7, %v469_v5  ;;  %v1601_v10 = vpop.f32.mrb[7].mxu0  ;;  %v1606_v11 = vpop.f32.mrb[5].mxu1  ;;  %1087 = vmatprep.subr.bf16.mxu0 %v2304_v35 }
 0x16f   : > { %v513_v12 = vpop.f32.mrb[6].mxu1 }
 0x170   : > { %1487 = vmatmul.mubr.msk.bf16.gmra.mrb[20].mxu0 %vm725_vm2, %v682_v3  ;;  %v684_v13 = vpack.c.bf16 %v513_v12, %v510_v8  ;;  %v1607_v14 = vpop.f32.mrb[7].mxu1 }
 0x171   : > { %802 = vmatprep.mubr.bf16.mxu0 %v2005_v30  ;;  %1088 = vmatpush1.bf16.msra.mxu0 %v2308_v36  ;;  %v1801_v36 = vld [vmem:[#allocation8 + $0xe4] ss:$8 sps:$4 sm:$0xff]  }
 0x172   : > { %1089 = vmatprep.subr.bf16.mxu0 %v2310_v37  ;;  %v1799_v37 = vld [vmem:[#allocation8 + $0xe0] ss:$8 sps:$4 sm:$0xff]   ;;  %1646 = vmatprep.subr.bf16.mxu1 %v1801_v36 }
 0x173   : > { %v551_v15 = vpop.f32.mrb[8].mxu0  ;;  %1662 = vmatpush1.bf16.msra.mxu1 %v1799_v37 }
 0x174   : > { %v1612_v16 = vpop.f32.mrb[9].mxu0 }
 0x175   : > { %v554_v17 = vpop.f32.mrb[10].mxu0  ;;  %v592_v18 = vpop.f32.mrb[8].mxu1  ;;  %1090 = vmatpush1.bf16.msra.mxu0 %v2314_v38  ;;  %v1804_v38 = vld [vmem:[#allocation8 + $0xf4] ss:$8 sps:$4 sm:$0xff]  }
 0x176   : > { %v685_v19 = vpack.c.bf16 %v554_v17, %v551_v15  ;;  %v1613_v20 = vpop.f32.mrb[11].mxu0  ;;  %v1618_v21 = vpop.f32.mrb[9].mxu1  ;;  %1091 = vmatprep.subr.bf16.mxu0 %v2316_v39  ;;  %v1802_v39 = vld [vmem:[#allocation8 + $0xf0] ss:$8 sps:$4 sm:$0xff]   ;;  %1647 = vmatprep.subr.bf16.mxu1 %v1804_v38 }
 0x177   : > { %v595_v22 = vpop.f32.mrb[10].mxu1  ;;  %1663 = vmatpush1.bf16.msra.mxu1 %v1802_v39 }
 0x178   : > { %1488 = vmatmul.mubr.msk.bf16.gmra.mrb[24].mxu0 %vm725_vm2, %v683_v9  ;;  %v686_v23 = vpack.c.bf16 %v595_v22, %v592_v18  ;;  %v1619_v24 = vpop.f32.mrb[11].mxu1 }
 0x179   : > { %812 = vmatprep.mubr.bf16.mxu0 %v2005_v30  ;;  %1092 = vmatpush1.bf16.msra.mxu0 %v2320_v40 }
 0x17a   : > { %1093 = vmatprep.subr.bf16.mxu0 %v2322_v41 }
 0x17b   : > { %v633_v25 = vpop.f32.mrb[12].mxu0 }
 0x17c   : > { %v1624_v26 = vpop.f32.mrb[13].mxu0 }
 0x17d   : > { %v636_v27 = vpop.f32.mrb[14].mxu0  ;;  %v674_v28 = vpop.f32.mrb[12].mxu1  ;;  %1094 = vmatpush1.bf16.msra.mxu0 %v2326_v42  ;;  %v693_v42 = vld [vmem:[%s2583_s3] sm:$0x3] }
 0x17e   : > { %v687_v29 = vpack.c.bf16 %v636_v27, %v633_v25  ;;  %v1625_v31 = vpop.f32.mrb[15].mxu0  ;;  %v1630_v32 = vpop.f32.mrb[13].mxu1  ;;  %1095 = vmatprep.subr.bf16.mxu0 %v2328_v43 }
 0x17f   : > { %v677_v33 = vpop.f32.mrb[14].mxu1 }
 0x180   : > { %1489 = vmatmul.mubr.msk.bf16.gmra.mrb[28].mxu0 %vm725_vm2, %v684_v13  ;;  %v688_v34 = vpack.c.bf16 %v677_v33, %v674_v28  ;;  %v1631_v35 = vpop.f32.mrb[15].mxu1 }
 0x181   : > { %822 = vmatprep.mubr.bf16.mxu0 %v2005_v30  ;;  %1096 = vmatpush1.bf16.msra.mxu0 %v2332_v44 }
 0x182   : > { %1097 = vmatprep.subr.bf16.mxu0 %v2334_v45 }
 0x185   : > { %1098 = vmatpush1.bf16.msra.mxu0 %v2338_v46 }
 0x186   : > { %1099 = vmatprep.subr.bf16.mxu0 %v2340_v47 }
 0x188   : > { %1490 = vmatmul.mubr.msk.bf16.gmra.mrb[32].mxu0 %vm725_vm2, %v685_v19 }
 0x189   : > { %832 = vmatprep.mubr.bf16.mxu0 %v2005_v30  ;;  %1100 = vmatpush1.bf16.msra.mxu0 %v2344_v48 }
 0x18a   : > { %1101 = vmatprep.subr.bf16.mxu0 %v2346_v49 }
 0x18d   : > { %1102 = vmatpush1.bf16.msra.mxu0 %v2350_v50 }
 0x18e   : > { %1103 = vmatprep.subr.bf16.mxu0 %v2352_v51 }
 0x190   : > { %1491 = vmatmul.mubr.msk.bf16.gmra.mrb[36].mxu0 %vm725_vm2, %v686_v23 }
 0x191   : > { %842 = vmatprep.mubr.bf16.mxu0 %v2005_v30  ;;  %1104 = vmatpush1.bf16.msra.mxu0 %v2356_v52 }
 0x192   : > { %1105 = vmatprep.subr.bf16.mxu0 %v2358_v53 }
 0x195   : > { %1106 = vmatpush1.bf16.msra.mxu0 %v2362_v54 }
 0x196   : > { %1107 = vmatprep.subr.bf16.mxu0 %v2364_v55 }
 0x198   : > { %1492 = vmatmul.mubr.msk.bf16.gmra.mrb[40].mxu0 %vm725_vm2, %v687_v29 }
 0x199   : > { %852 = vmatprep.mubr.bf16.mxu0 %v2005_v30  ;;  %1108 = vmatpush1.bf16.msra.mxu0 %v2368_v56  ;;  %v695_v30 = vlaneseq }
 0x19a   : > { %1109 = vmatprep.subr.bf16.mxu0 %v2370_v57 }
 0x19b   : > { %v2419_v40 = vshrl.u32 %v695_v30, 7 }
 0x19d   : > { %1110 = vmatpush1.bf16.msra.mxu0 %v2374_v58  ;;  %v697_v41 = vsub.s32 0, %v2419_v40  ;;  %v701_v43 = vsub.s32 1, %v2419_v40 }
 0x19e   : > { %1111 = vmatprep.subr.bf16.mxu0 %v1801_v36 }
 0x19f   : > { %v2428_v44 = vrot.slane %v693_v42, %v697_v41  ;;  %v2432_v46 = vrot.slane %v693_v42, %v701_v43 }
 0x1a0   : > { %1493 = vmatmul.mubr.msk.bf16.gmra.mrb[44].mxu0 %vm725_vm2, %v688_v34 }
 0x1a1   : > { %1112 = vmatpush1.bf16.msra.mxu0 %v1799_v37 }
 0x1a2   : > { %1113 = vmatprep.subr.bf16.mxu0 %v1804_v38 }
 0x1a5   : > { %1114 = vmatpush1.bf16.msra.mxu0 %v1802_v39 }
 0x23b   : > { %v784_v45 = vpop.f32.mrb[16].mxu0 }
 0x23c   : > { %v786_v47 = vpop.f32.mrb[17].mxu0  ;;  %v785_v49 = vadd.f32 %v784_v45, %v2428_v44 }
 0x23d   : > { %v788_v48 = vpop.f32.mrb[18].mxu0  ;;  %v787_v52 = vadd.f32 %v786_v47, %v2432_v46 }
 0x23e   : > { %v789_v50 = vadd.f32 %v788_v48, %v2428_v44  ;;  %v790_v51 = vpop.f32.mrb[19].mxu0 }
 0x23f   : > { %v791_v53 = vadd.f32 %v790_v51, %v2432_v46 }
 0x240   : > { %v863_v54 = vpack.c.bf16 %v789_v50, %v785_v49 }
 0x241   : > { %v864_v55 = vpack.c.bf16 %v791_v53, %v787_v52 }
 0x243   : > { %v794_v56 = vpop.f32.mrb[20].mxu0  ;;  %1115 = vmatprep.mubr.bf16.mxu0 %v864_v55 }
 0x244   : > { %v796_v57 = vpop.f32.mrb[21].mxu0  ;;  %1116 = vmatmul.mubr.bf16.vlgmr.msra.gmra.mrb[48].mxu0 %v863_v54  ;;  %v795_v59 = vadd.f32 %v794_v56, %v2428_v44 }
 0x245   : > { %v798_v58 = vpop.f32.mrb[22].mxu0  ;;  %v797_v62 = vadd.f32 %v796_v57, %v2432_v46 }
 0x246   : > { %v799_v60 = vadd.f32 %v798_v58, %v2428_v44  ;;  %v800_v61 = vpop.f32.mrb[23].mxu0 }
 0x247   : > { %v801_v63 = vadd.f32 %v800_v61, %v2432_v46 }
 0x248   : > { %v865_v0 = vpack.c.bf16 %v799_v60, %v795_v59 }
 0x249   : > { %v866_v1 = vpack.c.bf16 %v801_v63, %v797_v62 }
 0x24b   : > { %v804_v2 = vpop.f32.mrb[24].mxu0  ;;  %1125 = vmatprep.mubr.bf16.mxu0 %v866_v1 }
 0x24c   : > { %v806_v3 = vpop.f32.mrb[25].mxu0  ;;  %1126 = vmatmul.mubr.bf16.gmra.mrb[52].mxu0 %v865_v0  ;;  %v805_v5 = vadd.f32 %v804_v2, %v2428_v44 }
 0x24d   : > { %v808_v4 = vpop.f32.mrb[26].mxu0  ;;  %v807_v8 = vadd.f32 %v806_v3, %v2432_v46  ;;  %v911_v3 = vld [vmem:[%s2585_s5] sm:$0x3] }
 0x24e   : > { %v809_v6 = vadd.f32 %v808_v4, %v2428_v44  ;;  %v810_v7 = vpop.f32.mrb[27].mxu0  ;;  %v2471_v4 = vrot.slane %v911_v3, %v697_v41 }
 0x24f   : > { %v811_v9 = vadd.f32 %v810_v7, %v2432_v46 }
 0x250   : > { %v867_v10 = vpack.c.bf16 %v809_v6, %v805_v5 }
 0x251   : > { %v868_v11 = vpack.c.bf16 %v811_v9, %v807_v8 }
 0x253   : > { %v814_v12 = vpop.f32.mrb[28].mxu0  ;;  %1135 = vmatprep.mubr.bf16.mxu0 %v868_v11 }
 0x254   : > { %v816_v13 = vpop.f32.mrb[29].mxu0  ;;  %1136 = vmatmul.mubr.bf16.gmra.mrb[56].mxu0 %v867_v10  ;;  %v815_v15 = vadd.f32 %v814_v12, %v2428_v44 }
 0x255   : > { %v818_v14 = vpop.f32.mrb[30].mxu0  ;;  %v817_v18 = vadd.f32 %v816_v13, %v2432_v46 }
 0x256   : > { %v819_v16 = vadd.f32 %v818_v14, %v2428_v44  ;;  %v820_v17 = vpop.f32.mrb[31].mxu0 }
 0x257   : > { %v821_v19 = vadd.f32 %v820_v17, %v2432_v46 }
 0x258   : > { %v869_v20 = vpack.c.bf16 %v819_v16, %v815_v15 }
 0x259   : > { %v870_v21 = vpack.c.bf16 %v821_v19, %v817_v18 }
 0x25b   : > { %v824_v22 = vpop.f32.mrb[32].mxu0  ;;  %1145 = vmatprep.mubr.bf16.mxu1 %v870_v21 }
 0x25c   : > { %v826_v23 = vpop.f32.mrb[33].mxu0  ;;  %1146 = vmatmul.mubr.bf16.vlgmr.msra.gmra.mrb[16].mxu1 %v869_v20  ;;  %v825_v25 = vadd.f32 %v824_v22, %v2428_v44 }
 0x25d   : > { %v828_v24 = vpop.f32.mrb[34].mxu0  ;;  %v827_v28 = vadd.f32 %v826_v23, %v2432_v46 }
 0x25e   : > { %v829_v26 = vadd.f32 %v828_v24, %v2428_v44  ;;  %v830_v27 = vpop.f32.mrb[35].mxu0 }
 0x25f   : > { %v831_v29 = vadd.f32 %v830_v27, %v2432_v46 }
 0x260   : > { %v871_v31 = vpack.c.bf16 %v829_v26, %v825_v25 }
 0x261   : > { %v872_v32 = vpack.c.bf16 %v831_v29, %v827_v28 }
 0x263   : > { %v834_v33 = vpop.f32.mrb[36].mxu0  ;;  %1155 = vmatprep.mubr.bf16.mxu1 %v872_v32 }
 0x264   : > { %v836_v34 = vpop.f32.mrb[37].mxu0  ;;  %1156 = vmatmul.mubr.bf16.gmra.mrb[20].mxu1 %v871_v31  ;;  %v835_v36 = vadd.f32 %v834_v33, %v2428_v44 }
 0x265   : > { %v838_v35 = vpop.f32.mrb[38].mxu0  ;;  %v837_v39 = vadd.f32 %v836_v34, %v2432_v46 }
 0x266   : > { %v839_v37 = vadd.f32 %v838_v35, %v2428_v44  ;;  %v840_v38 = vpop.f32.mrb[39].mxu0 }
 0x267   : > { %v841_v30 = vadd.f32 %v840_v38, %v2432_v46 }
 0x268   : > { %v873_v42 = vpack.c.bf16 %v839_v37, %v835_v36 }
 0x269   : > { %v874_v45 = vpack.c.bf16 %v841_v30, %v837_v39 }
 0x26b   : > { %v844_v47 = vpop.f32.mrb[40].mxu0  ;;  %1165 = vmatprep.mubr.bf16.mxu1 %v874_v45 }
 0x26c   : > { %v846_v48 = vpop.f32.mrb[41].mxu0  ;;  %1166 = vmatmul.mubr.bf16.gmra.mrb[24].mxu1 %v873_v42  ;;  %v845_v50 = vadd.f32 %v844_v47, %v2428_v44 }
 0x26d   : > { %v848_v49 = vpop.f32.mrb[42].mxu0  ;;  %v847_v53 = vadd.f32 %v846_v48, %v2432_v46 }
 0x26e   : > { %v849_v51 = vadd.f32 %v848_v49, %v2428_v44  ;;  %v850_v52 = vpop.f32.mrb[43].mxu0 }
 0x26f   : > { %v851_v54 = vadd.f32 %v850_v52, %v2432_v46 }
 0x270   : > { %v875_v55 = vpack.c.bf16 %v849_v51, %v845_v50 }
 0x271   : > { %v876_v56 = vpack.c.bf16 %v851_v54, %v847_v53 }
 0x273   : > { %v854_v57 = vpop.f32.mrb[44].mxu0  ;;  %1175 = vmatprep.mubr.bf16.mxu1 %v876_v56 }
 0x274   : > { %v856_v58 = vpop.f32.mrb[45].mxu0  ;;  %1176 = vmatmul.mubr.bf16.gmra.mrb[28].mxu1 %v875_v55  ;;  %v855_v60 = vadd.f32 %v854_v57, %v2428_v44 }
 0x275   : > { %v858_v59 = vpop.f32.mrb[46].mxu0  ;;  %v857_v63 = vadd.f32 %v856_v58, %v2432_v46 }
 0x276   : > { %v859_v61 = vadd.f32 %v858_v59, %v2428_v44  ;;  %v860_v62 = vpop.f32.mrb[47].mxu0  ;;  %v2475_v44 = vrot.slane %v911_v3, %v701_v43 }
 0x277   : > { %v861_v0 = vadd.f32 %v860_v62, %v2432_v46 }
 0x278   : > { %v877_v1 = vpack.c.bf16 %v859_v61, %v855_v60 }
 0x279   : > { %v878_v2 = vpack.c.bf16 %v861_v0, %v857_v63 }
 0x27b   : > { %1185 = vmatprep.mubr.bf16.mxu1 %v878_v2 }
 0x27c   : > { %1186 = vmatmul.mubr.bf16.gmra.mrb[32].mxu1 %v877_v1 }
 0x317   : > { %v1117_v5 = vpop.f32.mrb[48].mxu0 }
 0x318   : > { %v1118_v46 = vadd.f32 %v1117_v5, %v2471_v4  ;;  %v1119_v6 = vpop.f32.mrb[49].mxu0 }
 0x319   : > { %v1120_v7 = vadd.f32 %v1119_v6, %v2475_v44  ;;  %v1121_v8 = vpop.f32.mrb[50].mxu0 }
 0x31a   : > { %v1196_v9 = vmax.f32 %v1118_v46, 0.0  ;;  %v1122_v10 = vadd.f32 %v1121_v8, %v2471_v4  ;;  %v1123_v11 = vpop.f32.mrb[51].mxu0 }
 0x31b   : > { %v1197_v12 = vmax.f32 %v1120_v7, 0.0  ;;  %v1124_v13 = vadd.f32 %v1123_v11, %v2475_v44 }
 0x31c   : > { %v1198_v41 = vmax.f32 %v1122_v10, 0.0 }
 0x31d   : > { %v1550_v14 = vpack.c.bf16 %v1197_v12, %v1196_v9  ;;  %v1199_v15 = vmax.f32 %v1124_v13, 0.0 }
 0x31f   : > { %1324 = vst [vmem:[%s2483_s11] sm:$0xff] %v1550_v14  ;;  %v1551_v40 = vpack.c.bf16 %v1199_v15, %v1198_v41  ;;  %v1127_v43 = vpop.f32.mrb[52].mxu0 }
 0x320   : > { %v1128_v16 = vadd.f32 %v1127_v43, %v2471_v4  ;;  %v1129_v17 = vpop.f32.mrb[53].mxu0 }
 0x321   : > { %1325 = vst [vmem:[%s2483_s11 + $0x8] sm:$0xff] %v1551_v40  ;;  %v1130_v18 = vadd.f32 %v1129_v17, %v2475_v44  ;;  %v1131_v19 = vpop.f32.mrb[54].mxu0 }
 0x322   : > { %v1200_v20 = vmax.f32 %v1128_v16, 0.0  ;;  %v1132_v21 = vadd.f32 %v1131_v19, %v2471_v4  ;;  %v1133_v22 = vpop.f32.mrb[55].mxu0 }
 0x323   : > { %v1201_v23 = vmax.f32 %v1130_v18, 0.0  ;;  %v1134_v24 = vadd.f32 %v1133_v22, %v2475_v44 }
 0x324   : > { %v1202_v25 = vmax.f32 %v1132_v21, 0.0 }
 0x325   : > { %v1552_v26 = vpack.c.bf16 %v1201_v23, %v1200_v20  ;;  %v1203_v27 = vmax.f32 %v1134_v24, 0.0 }
 0x327   : > { %1326 = vst [vmem:[%s2483_s11 + $0x10] sm:$0xff] %v1552_v26  ;;  %v1553_v28 = vpack.c.bf16 %v1203_v27, %v1202_v25  ;;  %v1137_v29 = vpop.f32.mrb[56].mxu0 }
 0x328   : > { %v1138_v31 = vadd.f32 %v1137_v29, %v2471_v4  ;;  %v1139_v32 = vpop.f32.mrb[57].mxu0 }
 0x329   : > { %1327 = vst [vmem:[%s2483_s11 + $0x18] sm:$0xff] %v1553_v28  ;;  %v1140_v33 = vadd.f32 %v1139_v32, %v2475_v44  ;;  %v1141_v34 = vpop.f32.mrb[58].mxu0 }
 0x32a   : > { %v1204_v35 = vmax.f32 %v1138_v31, 0.0  ;;  %v1142_v36 = vadd.f32 %v1141_v34, %v2471_v4  ;;  %v1143_v37 = vpop.f32.mrb[59].mxu0 }
 0x32b   : > { %v1205_v38 = vmax.f32 %v1140_v33, 0.0  ;;  %v1144_v39 = vadd.f32 %v1143_v37, %v2475_v44 }
 0x32c   : > { %v1206_v30 = vmax.f32 %v1142_v36, 0.0 }
 0x32d   : > { %v1554_v42 = vpack.c.bf16 %v1205_v38, %v1204_v35  ;;  %v1207_v45 = vmax.f32 %v1144_v39, 0.0 }
 0x32f   : > { %1328 = vst [vmem:[%s2483_s11 + $0x20] sm:$0xff] %v1554_v42  ;;  %v1555_v47 = vpack.c.bf16 %v1207_v45, %v1206_v30  ;;  %v1147_v48 = vpop.f32.mrb[16].mxu1 }
 0x330   : > { %v1148_v49 = vadd.f32 %v1147_v48, %v2471_v4  ;;  %v1149_v50 = vpop.f32.mrb[17].mxu1 }
 0x331   : > { %1329 = vst [vmem:[%s2483_s11 + $0x28] sm:$0xff] %v1555_v47  ;;  %v1150_v51 = vadd.f32 %v1149_v50, %v2475_v44  ;;  %v1151_v52 = vpop.f32.mrb[18].mxu1 }
 0x332   : > { %v1208_v53 = vmax.f32 %v1148_v49, 0.0  ;;  %v1152_v54 = vadd.f32 %v1151_v52, %v2471_v4  ;;  %v1153_v55 = vpop.f32.mrb[19].mxu1 }
 0x333   : > { %v1209_v56 = vmax.f32 %v1150_v51, 0.0  ;;  %v1154_v57 = vadd.f32 %v1153_v55, %v2475_v44 }
 0x334   : > { %v1210_v58 = vmax.f32 %v1152_v54, 0.0 }
 0x335   : > { %v1556_v59 = vpack.c.bf16 %v1209_v56, %v1208_v53  ;;  %v1211_v60 = vmax.f32 %v1154_v57, 0.0 }
 0x337   : > { %1330 = vst [vmem:[%s2483_s11 + $0x30] sm:$0xff] %v1556_v59  ;;  %v1557_v61 = vpack.c.bf16 %v1211_v60, %v1210_v58  ;;  %v1157_v62 = vpop.f32.mrb[20].mxu1 }
 0x338   : > { %v1158_v63 = vadd.f32 %v1157_v62, %v2471_v4  ;;  %v1159_v0 = vpop.f32.mrb[21].mxu1 }
 0x339   : > { %1331 = vst [vmem:[%s2483_s11 + $0x38] sm:$0xff] %v1557_v61  ;;  %v1160_v1 = vadd.f32 %v1159_v0, %v2475_v44  ;;  %v1161_v2 = vpop.f32.mrb[22].mxu1 }
 0x33a   : > { %v1212_v3 = vmax.f32 %v1158_v63, 0.0  ;;  %v1162_v5 = vadd.f32 %v1161_v2, %v2471_v4  ;;  %v1163_v46 = vpop.f32.mrb[23].mxu1 }
 0x33b   : > { %v1213_v6 = vmax.f32 %v1160_v1, 0.0  ;;  %v1164_v7 = vadd.f32 %v1163_v46, %v2475_v44 }
 0x33c   : > { %v1214_v8 = vmax.f32 %v1162_v5, 0.0 }
 0x33d   : > { %v1558_v9 = vpack.c.bf16 %v1213_v6, %v1212_v3  ;;  %v1215_v10 = vmax.f32 %v1164_v7, 0.0 }
 0x33f   : > { %1332 = vst [vmem:[%s2483_s11 + $0x40] sm:$0xff] %v1558_v9  ;;  %v1559_v11 = vpack.c.bf16 %v1215_v10, %v1214_v8  ;;  %v1167_v12 = vpop.f32.mrb[24].mxu1 }
 0x340   : > { %v1168_v13 = vadd.f32 %v1167_v12, %v2471_v4  ;;  %v1169_v41 = vpop.f32.mrb[25].mxu1 }
 0x341   : > { %1333 = vst [vmem:[%s2483_s11 + $0x48] sm:$0xff] %v1559_v11  ;;  %v1170_v14 = vadd.f32 %v1169_v41, %v2475_v44  ;;  %v1171_v15 = vpop.f32.mrb[26].mxu1 }
 0x342   : > { %v1216_v40 = vmax.f32 %v1168_v13, 0.0  ;;  %v1172_v43 = vadd.f32 %v1171_v15, %v2471_v4  ;;  %v1173_v16 = vpop.f32.mrb[27].mxu1 }
 0x343   : > { %v1217_v17 = vmax.f32 %v1170_v14, 0.0  ;;  %v1174_v18 = vadd.f32 %v1173_v16, %v2475_v44 }
 0x344   : > { %v1218_v19 = vmax.f32 %v1172_v43, 0.0 }
 0x345   : > { %v1560_v20 = vpack.c.bf16 %v1217_v17, %v1216_v40  ;;  %v1219_v21 = vmax.f32 %v1174_v18, 0.0 }
 0x347   : > { %1334 = vst [vmem:[%s2483_s11 + $0x50] sm:$0xff] %v1560_v20  ;;  %v1561_v22 = vpack.c.bf16 %v1219_v21, %v1218_v19  ;;  %v1177_v23 = vpop.f32.mrb[28].mxu1 }
 0x348   : > { %v1178_v24 = vadd.f32 %v1177_v23, %v2471_v4  ;;  %v1179_v25 = vpop.f32.mrb[29].mxu1 }
 0x349   : > { %1335 = vst [vmem:[%s2483_s11 + $0x58] sm:$0xff] %v1561_v22  ;;  %v1180_v26 = vadd.f32 %v1179_v25, %v2475_v44  ;;  %v1181_v27 = vpop.f32.mrb[30].mxu1 }
 0x34a   : > { %v1220_v28 = vmax.f32 %v1178_v24, 0.0  ;;  %v1182_v29 = vadd.f32 %v1181_v27, %v2471_v4  ;;  %v1183_v31 = vpop.f32.mrb[31].mxu1 }
 0x34b   : > { %v1221_v32 = vmax.f32 %v1180_v26, 0.0  ;;  %v1184_v33 = vadd.f32 %v1183_v31, %v2475_v44 }
 0x34c   : > { %v1222_v34 = vmax.f32 %v1182_v29, 0.0 }
 0x34d   : > { %v1562_v35 = vpack.c.bf16 %v1221_v32, %v1220_v28  ;;  %v1223_v36 = vmax.f32 %v1184_v33, 0.0 }
 0x34f   : > { %1336 = vst [vmem:[%s2483_s11 + $0x60] sm:$0xff] %v1562_v35  ;;  %v1563_v37 = vpack.c.bf16 %v1223_v36, %v1222_v34  ;;  %v1187_v38 = vpop.f32.mrb[32].mxu1 }
 0x350   : > { %v1188_v39 = vadd.f32 %v1187_v38, %v2471_v4  ;;  %v1189_v30 = vpop.f32.mrb[33].mxu1 }
 0x351   : > { %1337 = vst [vmem:[%s2483_s11 + $0x68] sm:$0xff] %v1563_v37  ;;  %v1190_v42 = vadd.f32 %v1189_v30, %v2475_v44  ;;  %v1191_v45 = vpop.f32.mrb[34].mxu1 }
 0x352   : > { %v1224_v47 = vmax.f32 %v1188_v39, 0.0  ;;  %v1192_v48 = vadd.f32 %v1191_v45, %v2471_v4  ;;  %v1193_v49 = vpop.f32.mrb[35].mxu1 }
 0x353   : > { %v1225_v50 = vmax.f32 %v1190_v42, 0.0  ;;  %v1194_v51 = vadd.f32 %v1193_v49, %v2475_v44 }
 0x354   : > { %v1226_v52 = vmax.f32 %v1192_v48, 0.0 }
 0x355   : > { %v1564_v53 = vpack.c.bf16 %v1225_v50, %v1224_v47  ;;  %v1227_v54 = vmax.f32 %v1194_v51, 0.0 }
 0x357   : > { %1338 = vst [vmem:[%s2483_s11 + $0x70] sm:$0xff] %v1564_v53  ;;  %v1565_v4 = vpack.c.bf16 %v1227_v54, %v1226_v52 }
 0x359   : > { %1339 = vst [vmem:[%s2483_s11 + $0x78] sm:$0xff] %v1565_v4 }
 0x35a   : > { %1932 = shalt.err (!%p1929_p4)
}
 0x35b   : > { %s1933_s1 = scalar_lea.hbm %s2532_s7, 2048  ;;  %s1937_s19 = scalar_lea.hbm %s2586_s6, 4096 }
 0x35c   : > { %p1934_p9 = scmp.ne.s32.totalorder %s2532_s7, %s1933_s1  ;;  %p1938_p8 = scmp.lt.u32.totalorder %s2532_s7, %s2586_s6 }
 0x35d   : > { %p1939_p13 = scmp.lt.u32.totalorder %s1937_s19, %s1933_s1  ;;  %p1941_p10 = scmp.lt.u32.totalorder %s1933_s1, %s2532_s7 }
 0x35e   : > { %p1935_p0 = pnand %p1934_p9, %p2192_p5 }
 0x35f   : > { %p1940_p6 = por %p1939_p13, %p1938_p8 }
 0x360   : > { %p1936_p11 = pneg %p1935_p0 }
 0x361   : > { %p1942_p3 = por %p1941_p10, %p1940_p6 }
 0x363   : > { %p1943_p7 = pnand %p1942_p3, %p1936_p11 }
 0x365   : > { %1946 = shalt.err (!%p1943_p7)
}
 0x366   : > { %s2007_s10 = smov 128   ;;  %s2008_s18 = smov 8  }
 0x367   : > { %1678 = dma.vmem_to_hbm [thread:$0]  (%p2192_p5), %s2534_s26, 2048, %s2532_s7, %s1341_s8, %s2007_s10, %s2007_s10, %s2008_s18  }
 0x368 PF: > { %s1370_s13 = sand.u32 1, %s1981_s21   ;;  %p2606_p12 = scmp.ne.s32.totalorder %s2592_s28, 0 }
 0x369   : > { %p2607_p2 = scmp.ge.s32.totalorder %s1993_s24, 2  ;;  %s1371_s14 = scalar_lea.sflag [#allocation4], %s1370_s13 }
 0x36b   : > { %p1695_p1 = pnand %p2607_p2, %p2606_p12 }
 0x36d   : > { %1976 = dma.done.wait (!%p1695_p1), %s1371_s14, 2048  }
 0x36e   : > { %1978 = vsyncadd (!%p1695_p1), %s1371_s14, 4294965248  ;;  %p21_p4 = scmp.ge.s32.totalorder %s2157_s12, 4   ;;  %s2608_s21 = smov %s1985_s22 }
 0x36f   : > { %s2609_s22 = smov %s1989_s23  ;;  %s2610_s23 = smov %s2188_s30 }
 0x370   : > { %s2611_s24 = smov %s2157_s12  ;;  %23 = sbr.rel (!%p21_p4) target bundleno = 9 (0x9), region = 101 }
 0x377   :  { %1376 = vsyncpa [#allocation3], 1 }
 0x378   :  { %1378 = vsyncpa [#allocation3 + $0x1], 1 }
 0x379   :  { %1379 = vsyncpa [#allocation6], 1 }
 0x37a   :  { %1380 = vsyncpa [#allocation9], 1 }
 0x37b   :  { %1381 = vsyncpa [#allocation4], 1 }
 0x37c   :  { %1383 = vsyncpa [#allocation4 + $0x1], 1 }

</bundles_post_ra>
